<compile_context>
chip_gen: v6e
topology: v6e:2x2x1
jax: 0.10.0
libtpu: 0.0.40
codegen_flags: <defaults>
</compile_context>

<pallas_src>
from functools import partial

import jax
import jax.numpy as jnp
from jax import lax
from jax.experimental import pallas as pl
from jax.experimental.pallas import tpu as pltpu


def _fpn_kernel(x_ref, w_ref, b_ref, mtau_ref, mhat_ref,
                taus_ref, th_ref, ent_ref):
    f32 = jnp.float32

    # Linear layer: native dtype straight to the MXU, f32 accumulation.
    # HIGHEST precision only matters (and only costs) for f32 inputs.
    prec_in = lax.Precision.HIGHEST if x_ref.dtype == jnp.float32 else None
    logits = jnp.dot(x_ref[...], w_ref[...],
                     preferred_element_type=f32, precision=prec_in)
    logits = logits + b_ref[...].astype(f32)                       # (TB, N)

    # Numerically-stable softmax in f32.
    m = jnp.max(logits, axis=-1, keepdims=True)
    shifted = logits - m
    e = jnp.exp(shifted)
    denom = jnp.sum(e, axis=-1, keepdims=True)
    probs = e / denom                                               # (TB, N)

    # Categorical entropy without materializing log_probs:
    #   H = -sum(p * (shifted - log denom)) = log(denom) - sum(p * shifted)
    ent_ref[...] = jnp.log(denom) - jnp.sum(probs * shifted,
                                            axis=-1, keepdims=True)

    # taus     = probs @ M_tau,  M_tau[i, j] = 1 if j > i   (shape (N, N+1))
    #            -> taus[:, 0] = 0, taus[:, j] = sum_{i<j} p_i, taus[:, N] = 1
    # tau_hats = probs @ M_hat,  M_hat[i, j] = 1 if j > i, 0.5 if j == i
    #            -> csum_j - 0.5 * p_j == (taus[:, j] + taus[:, j+1]) / 2
    # Both land at lane 0 of their own output -> no cross-lane shifts.
    hi = lax.Precision.HIGHEST
    taus_ref[...] = jnp.dot(probs, mtau_ref[...],
                            preferred_element_type=f32, precision=hi)
    th_ref[...] = jnp.dot(probs, mhat_ref[...],
                          preferred_element_type=f32, precision=hi)


def _round_up(x, m):
    return ((x + m - 1) // m) * m


def _pick_tile_b(B, D, N, x_itemsize, vmem_budget_bytes, max_tile=4096):
    """VMEM-accounted batch tile: double-buffered x tile + double-buffered
    outputs (lane-padded to 128) + ~6 f32 (tile_b, N) temporaries."""
    lane = lambda n: _round_up(max(n, 1), 128)
    align = max(8, 32 // x_itemsize)          # f32: 8, bf16: 16, int8/fp8: 32
    per_row = (2 * D * x_itemsize
               + 2 * (lane(N + 1) + lane(N) + lane(1)) * 4
               + 6 * lane(N) * 4)
    t = min(max_tile, max(align, vmem_budget_bytes // per_row))
    # v7x has 2 TensorCores: keep >= 2 batch blocks whenever the batch allows
    # so dimension_semantics=("parallel",) can actually split the work.
    if B > align:
        t = min(t, _round_up((B + 1) // 2, align))
    t = max(align, (t // align) * align)
    if t >= B:
        t = B                                  # full-batch block is legal
    return int(t)


@partial(jax.jit, static_argnames=("tile_b", "vmem_budget_bytes"))
def fraction_proposal_forward(x, w_t, b, tile_b=None,
                              vmem_budget_bytes=24 * 1024 * 1024):
    """x: (B, D); w_t: (D, N) pre-transposed Linear weight; b: (N,) or (1, N).

    Returns (taus (B, N+1), tau_hats (B, N), entropies (B,)) as float32.
    """
    B, D = x.shape
    N = w_t.shape[1]
    itemsize = jnp.dtype(x.dtype).itemsize

    if tile_b is None:
        tile_b = _pick_tile_b(B, D, N, itemsize, vmem_budget_bytes)
    else:
        align = max(8, 32 // itemsize)
        tile_b = B if tile_b >= B else max(align, (tile_b // align) * align)

    grid = (pl.cdiv(B, tile_b),)              # no host-side padding of x

    # Constant cumsum / midpoint matrices (resident in VMEM across the grid).
    row = jnp.arange(N, dtype=jnp.int32)[:, None]
    col_tau = jnp.arange(N + 1, dtype=jnp.int32)[None, :]
    col_hat = jnp.arange(N, dtype=jnp.int32)[None, :]
    m_tau = (col_tau > row).astype(jnp.float32)                        # (N, N+1)
    m_hat = ((col_hat > row).astype(jnp.float32)
             + 0.5 * (col_hat == row).astype(jnp.float32))             # (N, N)
    b2 = jnp.asarray(b, jnp.float32).reshape(1, N)

    cost = pl.CostEstimate(
        flops=int(2 * B * D * N + 2 * B * N * (2 * N + 1)),
        transcendentals=int(B * (N + 1)),
        bytes_accessed=int(B * D * itemsize + B * (2 * N + 2) * 4
                           + D * N * itemsize + (N * (2 * N + 1) + N) * 4),
    )

    taus, tau_hats, ent = pl.pallas_call(
        _fpn_kernel,
        out_shape=(
            jax.ShapeDtypeStruct((B, N + 1), jnp.float32),
            jax.ShapeDtypeStruct((B, N), jnp.float32),
            jax.ShapeDtypeStruct((B, 1), jnp.float32),
        ),
        grid_spec=pltpu.PrefetchScalarGridSpec(
            num_scalar_prefetch=0,
            grid=grid,
            in_specs=[
                pl.BlockSpec((tile_b, D), lambda g: (g, 0)),   # x: batch-tiled
                pl.BlockSpec((D, N), lambda g: (0, 0)),        # W: resident
                pl.BlockSpec((1, N), lambda g: (0, 0)),        # bias: resident
                pl.BlockSpec((N, N + 1), lambda g: (0, 0)),    # M_tau: resident
                pl.BlockSpec((N, N), lambda g: (0, 0)),        # M_hat: resident
            ],
            out_specs=(
                pl.BlockSpec((tile_b, N + 1), lambda g: (g, 0)),
                pl.BlockSpec((tile_b, N), lambda g: (g, 0)),
                pl.BlockSpec((tile_b, 1), lambda g: (g, 0)),
            ),
        ),
        compiler_params=pltpu.CompilerParams(
            dimension_semantics=("parallel",),
            vmem_limit_bytes=48 * 1024 * 1024,
        ),
        cost_estimate=cost,
    )(x, w_t, b2, m_tau, m_hat)

    # Tiny (B*4 bytes) squeeze; stays fused inside this jit.
    return taus, tau_hats, ent[:, 0]


def init_params(key, embedding_dim, num_fractions):
    # xavier_uniform_ with gain=0.01 on weight (num_fractions, embedding_dim)
    fan_in, fan_out = embedding_dim, num_fractions
    gain = 0.01
    bound = gain * (6.0 / (fan_in + fan_out)) ** 0.5
    w = jax.random.uniform(
        key, (num_fractions, embedding_dim), jnp.float32, -bound, bound)
    b = jnp.zeros((num_fractions,), jnp.float32)   # constant_(bias, 0)
    return w, b


def reference_forward(x, w, b):
    # Pure-JAX reference matching the PyTorch module.
    logits = x @ w.T + b
    probs = jax.nn.softmax(logits, axis=1)
    log_probs = jax.nn.log_softmax(logits, axis=1)
    taus_1_N = jnp.cumsum(probs, axis=1)
    taus = jnp.pad(taus_1_N, ((0, 0), (1, 0)))
    tau_hats = (taus[:, :-1] + taus[:, 1:]) / 2.0
    entropies = -jnp.sum(probs * log_probs, axis=1)
    return taus, tau_hats, entropies


if __name__ == "__main__":
    key = jax.random.PRNGKey(0)
    ks = jax.random.split(key, 6)

    # --- Case 1: tiny shapes, single full-batch block path ---
    B0, D0, N0 = 2, 32, 8
    x0 = jax.random.normal(ks[0], (B0, D0), jnp.float32)
    w0, b0 = init_params(ks[1], D0, N0)
    t0, th0, e0 = fraction_proposal_forward(x0, w0.T, b0)
    jax.block_until_ready((t0, th0, e0))
    rt0, rth0, re0 = reference_forward(x0, w0, b0)
    assert t0.shape == (B0, N0 + 1)
    assert th0.shape == (B0, N0)
    assert e0.shape == (B0,)
    assert jnp.allclose(t0, rt0, atol=5e-5)
    assert jnp.allclose(th0, rth0, atol=5e-5)
    assert jnp.allclose(e0, re0, atol=5e-5)

    # --- Case 2: ragged batch -> auto tile, >=2 grid blocks, partial final
    #     block handled by Pallas (no host-side jnp.pad of x) ---
    B1, D1, N1 = 300, 256, 32
    x1 = jax.random.normal(ks[2], (B1, D1), jnp.float32)
    w1, b1 = init_params(ks[3], D1, N1)
    t1, th1, e1 = fraction_proposal_forward(x1, w1.T, b1)
    jax.block_until_ready((t1, th1, e1))
    rt1, rth1, re1 = reference_forward(x1, w1, b1)
    assert t1.shape == (B1, N1 + 1)
    assert th1.shape == (B1, N1)
    assert e1.shape == (B1,)
    assert jnp.allclose(t1, rt1, atol=5e-5)
    assert jnp.allclose(th1, rth1, atol=5e-5)
    assert jnp.allclose(e1, re1, atol=5e-5)

    # --- Case 3: bf16 activations/weights (halves input HBM bytes; softmax /
    #     cumsum / entropy stay f32 inside the kernel) ---
    B2, D2, N2 = 40, 64, 16
    x2 = jax.random.normal(ks[4], (B2, D2), jnp.float32)
    w2, b2 = init_params(ks[5], D2, N2)
    x2b = x2.astype(jnp.bfloat16)
    w2b_t = w2.T.astype(jnp.bfloat16)
    t2, th2, e2 = fraction_proposal_forward(x2b, w2b_t, b2)
    jax.block_until_ready((t2, th2, e2))
    rt2, rth2, re2 = reference_forward(
        x2b.astype(jnp.float32), w2.astype(jnp.bfloat16).astype(jnp.float32), b2)
    assert t2.shape == (B2, N2 + 1)
    assert jnp.allclose(t2, rt2, atol=3e-2)
    assert jnp.allclose(th2, rth2, atol=3e-2)
    assert jnp.allclose(e2, re2, atol=3e-2)

    print("KERNEL_OK")
</pallas_src>

<mosaic_0001>
module attributes {stable_mosaic.version = 11 : i64} {
  func.func @_fpn_kernel(%arg0: i32, %arg1: memref<2x32xf32, #tpu.memory_space<vmem>>, %arg2: memref<32x8xf32, #tpu.memory_space<vmem>>, %arg3: memref<1x8xf32, #tpu.memory_space<vmem>>, %arg4: memref<8x9xf32, #tpu.memory_space<vmem>>, %arg5: memref<8x8xf32, #tpu.memory_space<vmem>>, %arg6: memref<2x9xf32, #tpu.memory_space<vmem>>, %arg7: memref<2x8xf32, #tpu.memory_space<vmem>>, %arg8: memref<2x1xf32, #tpu.memory_space<vmem>>) attributes {dimension_semantics = [#tpu.dimension_semantics<parallel>], iteration_bounds = array<i64: 1>, scalar_prefetch = 0 : i64, scratch_operands = 0 : i64, tpu.core_type = #tpu.core_type<tc>, window_params = [{transform_indices = @transform_0, window_bounds = array<i64: 2, 32>}, {pipeline_mode = #tpu.pipeline_mode<synchronous>, transform_indices = @transform_1, window_bounds = array<i64: 32, 8>}, {pipeline_mode = #tpu.pipeline_mode<synchronous>, transform_indices = @transform_2, window_bounds = array<i64: 1, 8>}, {pipeline_mode = #tpu.pipeline_mode<synchronous>, transform_indices = @transform_3, window_bounds = array<i64: 8, 9>}, {pipeline_mode = #tpu.pipeline_mode<synchronous>, transform_indices = @transform_4, window_bounds = array<i64: 8, 8>}, {transform_indices = @transform_5, window_bounds = array<i64: 2, 9>}, {transform_indices = @transform_6, window_bounds = array<i64: 2, 8>}, {transform_indices = @transform_7, window_bounds = array<i64: 2, 1>}]} {
    %c0 = arith.constant 0 : index
    %c0_0 = arith.constant 0 : index
    %0 = vector.load %arg1[%c0, %c0_0] : memref<2x32xf32, #tpu.memory_space<vmem>>, vector<2x32xf32>
    %c0_1 = arith.constant 0 : index
    %c0_2 = arith.constant 0 : index
    %1 = vector.load %arg2[%c0_1, %c0_2] : memref<32x8xf32, #tpu.memory_space<vmem>>, vector<32x8xf32>
    %cst = arith.constant dense<0.000000e+00> : vector<2x8xf32>
    %2 = tpu.matmul %0, %1, %cst {dimension_numbers = #tpu.dot_dimension_numbers<[1], [0], [0], [1], [0, 0, 1, 1], [], []>, precision = #tpu.contract_precision<fp32>} : vector<2x32xf32>, vector<32x8xf32>, vector<2x8xf32> -> vector<2x8xf32>
    %c0_3 = arith.constant 0 : index
    %c0_4 = arith.constant 0 : index
    %3 = vector.load %arg3[%c0_3, %c0_4] : memref<1x8xf32, #tpu.memory_space<vmem>>, vector<1x8xf32>
    %4 = vector.broadcast %3 : vector<1x8xf32> to vector<2x8xf32>
    %5 = arith.addf %2, %4 : vector<2x8xf32>
    %cst_5 = arith.constant dense<0xFF800000> : vector<2xf32>
    %6 = vector.multi_reduction <maximumf>, %5, %cst_5 [1] : vector<2x8xf32> to vector<2xf32>
    %7 = vector.shape_cast %6 : vector<2xf32> to vector<2x1xf32>
    %8 = vector.broadcast %7 : vector<2x1xf32> to vector<2x8xf32>
    %9 = arith.subf %5, %8 : vector<2x8xf32>
    %10 = math.exp %9 : vector<2x8xf32>
    %cst_6 = arith.constant dense<0.000000e+00> : vector<2xf32>
    %11 = vector.multi_reduction <add>, %10, %cst_6 [1] : vector<2x8xf32> to vector<2xf32>
    %12 = vector.shape_cast %11 : vector<2xf32> to vector<2x1xf32>
    %13 = vector.broadcast %12 : vector<2x1xf32> to vector<2x8xf32>
    %14 = arith.divf %10, %13 : vector<2x8xf32>
    %15 = math.log %12 : vector<2x1xf32>
    %16 = arith.mulf %14, %9 : vector<2x8xf32>
    %cst_7 = arith.constant dense<0.000000e+00> : vector<2xf32>
    %17 = vector.multi_reduction <add>, %16, %cst_7 [1] : vector<2x8xf32> to vector<2xf32>
    %18 = vector.shape_cast %17 : vector<2xf32> to vector<2x1xf32>
    %19 = arith.subf %15, %18 : vector<2x1xf32>
    %c0_8 = arith.constant 0 : index
    %c0_9 = arith.constant 0 : index
    %20 = vector.load %arg8[%c0_8, %c0_9] : memref<2x1xf32, #tpu.memory_space<vmem>>, vector<2x1xf32>
    tpu.vector_store %arg8[%c0_8, %c0_9], %19 {strides = array<i32>} : memref<2x1xf32, #tpu.memory_space<vmem>>, vector<2x1xf32>,
    %c0_10 = arith.constant 0 : index
    %c0_11 = arith.constant 0 : index
    %21 = vector.load %arg4[%c0_10, %c0_11] : memref<8x9xf32, #tpu.memory_space<vmem>>, vector<8x9xf32>
    %cst_12 = arith.constant dense<0.000000e+00> : vector<2x9xf32>
    %22 = tpu.matmul %14, %21, %cst_12 {dimension_numbers = #tpu.dot_dimension_numbers<[1], [0], [0], [1], [0, 0, 1, 1], [], []>, precision = #tpu.contract_precision<fp32>} : vector<2x8xf32>, vector<8x9xf32>, vector<2x9xf32> -> vector<2x9xf32>
    %c0_13 = arith.constant 0 : index
    %c0_14 = arith.constant 0 : index
    %23 = vector.load %arg6[%c0_13, %c0_14] : memref<2x9xf32, #tpu.memory_space<vmem>>, vector<2x9xf32>
    tpu.vector_store %arg6[%c0_13, %c0_14], %22 {strides = array<i32>} : memref<2x9xf32, #tpu.memory_space<vmem>>, vector<2x9xf32>,
    %c0_15 = arith.constant 0 : index
    %c0_16 = arith.constant 0 : index
    %24 = vector.load %arg5[%c0_15, %c0_16] : memref<8x8xf32, #tpu.memory_space<vmem>>, vector<8x8xf32>
    %cst_17 = arith.constant dense<0.000000e+00> : vector<2x8xf32>
    %25 = tpu.matmul %14, %24, %cst_17 {dimension_numbers = #tpu.dot_dimension_numbers<[1], [0], [0], [1], [0, 0, 1, 1], [], []>, precision = #tpu.contract_precision<fp32>} : vector<2x8xf32>, vector<8x8xf32>, vector<2x8xf32> -> vector<2x8xf32>
    %c0_18 = arith.constant 0 : index
    %c0_19 = arith.constant 0 : index
    %26 = vector.load %arg7[%c0_18, %c0_19] : memref<2x8xf32, #tpu.memory_space<vmem>>, vector<2x8xf32>
    tpu.vector_store %arg7[%c0_18, %c0_19], %25 {strides = array<i32>} : memref<2x8xf32, #tpu.memory_space<vmem>>, vector<2x8xf32>,
    return
  }
  func.func @transform_0(%arg0: i32) -> (i32, i32) {
    %c0_i32 = arith.constant 0 : i32
    %c0_i32_0 = arith.constant 0 : i32
    return %arg0, %c0_i32 : i32, i32
  }
  func.func @transform_1(%arg0: i32) -> (i32, i32) {
    %c0_i32 = arith.constant 0 : i32
    %c0_i32_0 = arith.constant 0 : i32
    %c0_i32_1 = arith.constant 0 : i32
    return %c0_i32, %c0_i32_0 : i32, i32
  }
  func.func @transform_2(%arg0: i32) -> (i32, i32) {
    %c0_i32 = arith.constant 0 : i32
    %c0_i32_0 = arith.constant 0 : i32
    %c0_i32_1 = arith.constant 0 : i32
    return %c0_i32, %c0_i32_0 : i32, i32
  }
  func.func @transform_3(%arg0: i32) -> (i32, i32) {
    %c0_i32 = arith.constant 0 : i32
    %c0_i32_0 = arith.constant 0 : i32
    %c0_i32_1 = arith.constant 0 : i32
    return %c0_i32, %c0_i32_0 : i32, i32
  }
  func.func @transform_4(%arg0: i32) -> (i32, i32) {
    %c0_i32 = arith.constant 0 : i32
    %c0_i32_0 = arith.constant 0 : i32
    %c0_i32_1 = arith.constant 0 : i32
    return %c0_i32, %c0_i32_0 : i32, i32
  }
  func.func @transform_5(%arg0: i32) -> (i32, i32) {
    %c0_i32 = arith.constant 0 : i32
    %c0_i32_0 = arith.constant 0 : i32
    return %arg0, %c0_i32 : i32, i32
  }
  func.func @transform_6(%arg0: i32) -> (i32, i32) {
    %c0_i32 = arith.constant 0 : i32
    %c0_i32_0 = arith.constant 0 : i32
    return %arg0, %c0_i32 : i32, i32
  }
  func.func @transform_7(%arg0: i32) -> (i32, i32) {
    %c0_i32 = arith.constant 0 : i32
    %c0_i32_0 = arith.constant 0 : i32
    return %arg0, %c0_i32 : i32, i32
  }
}

</mosaic_0001>

<bundles_post_ra>
// kernel: fraction_proposal_forward.1
= control target key start
LH: loop header
LB: loop body
LE: loop exit
PB: predicated region body
PF: predicated region fallthrough
CT: control target
= control target key end

     0   :  { %13 = vsyncpa [#allocation3], 0  ;;  %vm37_vm0 = vcmask 261120   ;;  %v1715_v3 = vmov 0.0   ;;  %vm1716_vm1 = vmmov 0   ;;  %s1898_s0 = inlined_call_operand.vmem [shape: f32[2,32], index: 0, kind: input, shape index: {}]   ;;  %s1899_s1 = inlined_call_operand.vmem [shape: f32[32,8], index: 1, kind: input, shape index: {}]   ;;  %s1900_s2 = inlined_call_operand.vmem [shape: f32[1,8], index: 2, kind: input, shape index: {}]   ;;  %s1901_s3 = inlined_call_operand.vmem [shape: f32[8,9], index: 3, kind: input, shape index: {}]   ;;  %s1902_s4 = inlined_call_operand.vmem [shape: f32[8,8], index: 4, kind: input, shape index: {}]   ;;  %s1903_s5 = inlined_call_operand.hbm [shape: f32[2,9], index: 5, kind: output, shape index: {0}]   ;;  %s1904_s6 = inlined_call_operand.hbm [shape: f32[2,8], index: 6, kind: output, shape index: {1}]   ;;  %s1905_s7 = inlined_call_operand.vmem [shape: f32[2,1], index: 7, kind: output, shape index: {2}]  }
   0x1   :  { %v29_v0 = vld [vmem:[%s1899_s1 + $0x18] sm:$0xff]  ;;  %v28_v1 = vld [vmem:[%s1899_s1 + $0x10] sm:$0xff]  ;;  %v27_v2 = vld [vmem:[%s1899_s1 + $0x8] sm:$0xff]  ;;  %1535 = vmatprep.subr.mxu0 %v1715_v3  ;;  %1546 = vmatprep.subr.mxu1 %v1715_v3 }
   0x2   :  { %v1769_v4 = vand.u32 4294901760, %v29_v0  ;;  %v1771_v5 = vand.u32 4294901760, %v28_v1  ;;  %v1773_v6 = vand.u32 4294901760, %v27_v2  ;;  %v26_v7 = vld [vmem:[%s1899_s1] sm:$0xff]  ;;  %1543 = vmatprep.mubr.msk.f32.mxu0 %vm1716_vm1, %v1715_v3  ;;  %1554 = vmatprep.mubr.msk.f32.mxu1 %vm1716_vm1, %v1715_v3 }
   0x3   :  { %v25_v8 = vld [vmem:[%s1898_s0] sm:$0x3]  ;;  %v1782_v9 = vand.u32 4294901760, %v26_v7 }
   0x4   :  { %v39_v10 = vsel %vm37_vm0, %v25_v8, 0 }
   0x5   :  { %14 = vsyncpa [#allocation5], 0  ;;  %1536 = vmatpush3.msra.mxu0 %v1769_v4  ;;  %v146_v11 = vsub.f32 %v29_v0, %v1769_v4  ;;  %v1790_v12 = vand.u32 4294901760, %v39_v10  ;;  %v153_v13 = vsub.f32 %v28_v1, %v1771_v5  ;;  %v160_v14 = vsub.f32 %v27_v2, %v1773_v6  ;;  %v1480_v35 = vld [vmem:[%s1900_s2] ss:$0 sm:$0xff]  ;;  %s1717_s14 = smov [#allocation2]  }
   0x6   :  { %1537 = vmatprep.subr.mxu0 %v1715_v3  ;;  %v167_v15 = vsub.f32 %v26_v7, %v1782_v9  ;;  %vm526_vm2 = vcmask 58368   ;;  %v547_v57 = vld [vmem:[%s1901_s3] sm:$0xff]  ;;  %vm548_vm3 = vcmask 64512   ;;  %vm545_vm4 = vcmask 1024   ;;  %s1454_s15 = sshll.u32 %s1717_s14, 4  ;;  %s1455_s15 = int_to_ptr.vmem [resolvable:$true] %s1454_s15 }
   0x7   :  { %1538 = vmatpush3.msra.mxu0 %v1771_v5  ;;  %v147_v16 = vand.u32 4294901760, %v146_v11  ;;  %v111_v17 = vsub.f32 %v39_v10, %v1790_v12  ;;  %v154_v18 = vand.u32 4294901760, %v153_v13  ;;  %v161_v19 = vand.u32 4294901760, %v160_v14  ;;  %v1000_v0 = vld [vmem:[%s1902_s4] sm:$0xff]  ;;  %p1676_p1 = scmp.lt.s32.totalorder %s1455_s15, %s1455_s15 }
   0x8   :  { %1539 = vmatprep.subr.mxu0 %v1715_v3  ;;  %v168_v20 = vand.u32 4294901760, %v167_v15  ;;  %v583_v58 = vand.u32 4294901760, %v547_v57  ;;  %v1032_v1 = vand.u32 4294901760, %v1000_v0  ;;  %vm998_vm5 = vcmask 66560  }
   0x9   :  { %1540 = vmatpush3.msra.mxu0 %v1773_v6  ;;  %v148_v21 = vsub.f32 %v146_v11, %v147_v16  ;;  %v112_v22 = vand.u32 4294901760, %v111_v17  ;;  %v155_v23 = vsub.f32 %v153_v13, %v154_v18  ;;  %v162_v24 = vsub.f32 %v160_v14, %v161_v19 }
   0xa   :  { %1541 = vmatprep.subr.mxu0 %v1715_v3  ;;  %v169_v28 = vsub.f32 %v167_v15, %v168_v20  ;;  %v660_v59 = vsub.f32 %v547_v57, %v583_v58 }
   0xb   :  { %1542 = vmatpush3.msra.mxu0 %v1782_v9  ;;  %v149_v25 = vand.u32 4294901760, %v148_v21  ;;  %v113_v26 = vsub.f32 %v111_v17, %v112_v22  ;;  %v156_v27 = vand.u32 4294901760, %v155_v23  ;;  %v163_v30 = vand.u32 4294901760, %v162_v24 }
   0xc   :  { %1557 = vmatprep.subr.mxu0 %v1715_v3  ;;  %v170_v31 = vand.u32 4294901760, %v169_v28  ;;  %v661_v60 = vand.u32 4294901760, %v660_v59 }
   0xd   :  { %1547 = vmatpush3.msra.mxu1 %v149_v25  ;;  %v114_v29 = vand.u32 4294901760, %v113_v26 }
   0xe   :  { %1548 = vmatprep.subr.mxu1 %v1715_v3  ;;  %v662_v61 = vsub.f32 %v660_v59, %v661_v60 }
   0xf   :  { %1544 = vmatmul.mubr.f32.vlgmr.msra.gmra.mxu0 %v114_v29  ;;  %1549 = vmatpush3.msra.mxu1 %v156_v27 }
  0x10   :  { %1558 = vmatpush3.msra.mxu0 %v146_v11  ;;  %1550 = vmatprep.subr.mxu1 %v1715_v3  ;;  %v663_v62 = vand.u32 4294901760, %v662_v61 }
  0x11   :  { %1559 = vmatprep.subr.mxu0 %v1715_v3  ;;  %1551 = vmatpush3.msra.mxu1 %v163_v30 }
  0x12   :  { %1560 = vmatpush3.msra.mxu0 %v153_v13  ;;  %1552 = vmatprep.subr.mxu1 %v1715_v3 }
  0x13   :  { %1561 = vmatprep.subr.mxu0 %v1715_v3  ;;  %1553 = vmatpush3.msra.mxu1 %v170_v31 }
  0x14   :  { %1562 = vmatpush3.msra.mxu0 %v160_v14  ;;  %1555 = vmatmul.mubr.f32.vlgmr.msra.gmra.mxu1 %v1790_v12 }
  0x15   :  { %1563 = vmatprep.subr.mxu0 %v1715_v3  ;;  %1568 = vmatprep.subr.mxu1 %v1715_v3 }
  0x16   :  { %1564 = vmatpush3.msra.mxu0 %v167_v15  ;;  %1569 = vmatpush3.msra.mxu1 %v1769_v4 }
  0x17   :  { %1565 = vmatprep.mubr.msk.f32.mxu0 %vm1716_vm1, %v1715_v3  ;;  %1570 = vmatprep.subr.mxu1 %v1715_v3 }
  0x18   :  { %1579 = vmatprep.subr.mxu0 %v1715_v3  ;;  %1566 = vmatmul.mubr.f32.vlgmr.msra.gmra.mxu0 %v111_v17 }
  0x19   :  { %1571 = vmatpush3.msra.mxu1 %v1771_v5  ;;  %1580 = vmatpush3.msra.mxu0 %v147_v16 }
  0x1a   :  { %1572 = vmatprep.subr.mxu1 %v1715_v3  ;;  %1581 = vmatprep.subr.mxu0 %v1715_v3 }
  0x1b   :  { %1573 = vmatpush3.msra.mxu1 %v1773_v6  ;;  %1582 = vmatpush3.msra.mxu0 %v154_v18 }
  0x1c   :  { %1574 = vmatprep.subr.mxu1 %v1715_v3  ;;  %1583 = vmatprep.subr.mxu0 %v1715_v3 }
  0x1d   :  { %1575 = vmatpush3.msra.mxu1 %v1782_v9  ;;  %1576 = vmatprep.mubr.msk.f32.mxu1 %vm1716_vm1, %v1715_v3 }
  0x1e   :  { %1584 = vmatpush3.msra.mxu0 %v161_v19  ;;  %1577 = vmatmul.mubr.f32.vlgmr.msra.gmra.mxu1 %v112_v22 }
  0x1f   :  { %1585 = vmatprep.subr.mxu0 %v1715_v3  ;;  %1590 = vmatprep.subr.mxu1 %v1715_v3 }
  0x20   :  { %1586 = vmatpush3.msra.mxu0 %v168_v20  ;;  %1587 = vmatprep.mubr.msk.f32.mxu0 %vm1716_vm1, %v1715_v3 }
  0x21   :  { %1591 = vmatpush3.msra.mxu1 %v1769_v4  ;;  %1588 = vmatmul.mubr.f32.vlgmr.msra.gmra.mxu0 %v1790_v12  ;;  %v1109_v4 = vsub.f32 %v1000_v0, %v1032_v1 }
  0x22   :  { %1592 = vmatprep.subr.mxu1 %v1715_v3  ;;  %1598 = vmatprep.mubr.msk.f32.mxu1 %vm1716_vm1, %v1715_v3 }
  0x23   :  { %1593 = vmatpush3.msra.mxu1 %v1771_v5  ;;  %1601 = vmatprep.subr.mxu0 %v1715_v3 }
  0x24   :  { %1594 = vmatprep.subr.mxu1 %v1715_v3  ;;  %1603 = vmatprep.mubr.msk.f32.mxu0 %vm1716_vm1, %v1715_v3 }
  0x25   :  { %1595 = vmatpush3.msra.mxu1 %v1773_v6  ;;  %1602 = vmatpush3.msra.mxu0 %v583_v58 }
  0x26   :  { %1596 = vmatprep.subr.mxu1 %v1715_v3  ;;  %1611 = vmatprep.subr.mxu0 %v1715_v3 }
  0x27   :  { %1597 = vmatpush3.msra.mxu1 %v1782_v9  ;;  %v1110_v9 = vand.u32 4294901760, %v1109_v4 }
  0x28   :  { %1599 = vmatmul.mubr.f32.vlgmr.msra.gmra.mxu1 %v1790_v12  ;;  %1606 = vmatprep.subr.mxu1 %v1715_v3 }
  0x29   :  { %1608 = vmatprep.mubr.msk.f32.mxu1 %vm1716_vm1, %v1715_v3  ;;  %1607 = vmatpush3.msra.mxu1 %v663_v62  ;;  %v1111_v13 = vsub.f32 %v1109_v4, %v1110_v9 }
  0x2a   :  { %1616 = vmatprep.subr.mxu1 %v1715_v3 }
  0x2b   :  { %v1112_v16 = vand.u32 4294901760, %v1111_v13 }
  0xcf   :  { %v116_v32 = vpop.f32.mrf.mxu0 }
  0xd0   :  { %v117_v38 = vadd.f32 %v1480_v35, %v116_v32 }
  0xd1   :  { %v1545_v33 = vpop.f32.mrf.mxu0 }
  0xd4   :  { %v207_v34 = vpop.f32.mrf.mxu1 }
  0xd5   :  { %v208_v40 = vadd.f32 %v207_v34, %v117_v38 }
  0xd6   :  { %v1556_v36 = vpop.f32.mrf.mxu1 }
  0xd8   :  { %v287_v37 = vpop.f32.mrf.mxu0 }
  0xd9   :  { %v288_v43 = vadd.f32 %v287_v37, %v208_v40 }
  0xda   :  { %v1567_v39 = vpop.f32.mrf.mxu0 }
  0xde   :  { %v364_v41 = vpop.f32.mrf.mxu1 }
  0xdf   :  { %v365_v45 = vadd.f32 %v364_v41, %v288_v43 }
  0xe0   :  { %v1578_v42 = vpop.f32.mrf.mxu1 }
  0xe1   :  { %v447_v44 = vpop.f32.mrf.mxu0 }
  0xe2   :  { %v448_v47 = vadd.f32 %v447_v44, %v365_v45 }
  0xe3   :  { %v1589_v46 = vpop.f32.mrf.mxu0 }
  0xe8   :  { %v522_v48 = vpop.f32.mrf.mxu1 }
  0xe9   :  { %v523_v49 = vadd.f32 %v522_v48, %v448_v47 }
  0xea   :  { %v1600_v50 = vpop.f32.mrf.mxu1 }
  0xeb   :  { %v527_v51 = vsel %vm526_vm2, %v523_v49, -inf }
  0xec   :  { %528 = vmax.xlane.f32.xlu0 %v527_v51 }
 0x175   :  { %v529_v52 = vpop.xlane.xlu0 %528 }
 0x176   :  { %v530_v53 = vsub.f32 %v523_v49, %v529_v52 }
 0x178   :  { %v531_v54 = vmul.f32 1.442695, %v530_v53 }
 0x17a   :  { %1665 = vpow2.f32 %v531_v54 }
 0x187   :  { %v1666_v55 = vpop.eup %1665 }
 0x188   :  { %v533_v56 = vsel %vm526_vm2, %v1666_v55, 0.0 }
 0x189   :  { %534 = vadd.xlane.f32.xlu0 %v533_v56 }
 0x212   :  { %v535_v63 = vpop.xlane.xlu0 %534 }
 0x213   :  { %1667 = vrcp.f32 %v535_v63 }
 0x214   :  { %1669 = vlog2.f32 %v535_v63 }
 0x220   :  { %v1668_v2 = vpop.eup %1667 }
 0x221   :  { %v537_v5 = vmul.f32 %v1668_v2, %v1666_v55  ;;  %v1670_v17 = vpop.eup %1669 }
 0x222   :  { %v539_v18 = vmul.f32 0.6931472, %v1670_v17 }
 0x223   :  { %v550_v6 = vsel %vm548_vm3, %v537_v5, 0  ;;  %v540_v7 = vmul.f32 %v537_v5, %v530_v53 }
 0x224   :  { %v618_v8 = vand.u32 4294901760, %v550_v6 }
 0x225   :  { %v541_v10 = vsel %vm526_vm2, %v540_v7, 0.0 }
 0x226   :  { %1609 = vmatmul.mubr.f32.vlgmr.msra.gmra.mxu1 %v618_v8  ;;  %542 = vadd.xlane.f32.xlu1 %v541_v10  ;;  %v619_v11 = vsub.f32 %v550_v6, %v618_v8 }
 0x227   :  { %1617 = vmatpush3.msra.mxu1 %v583_v58  ;;  %1618 = vmatprep.mubr.msk.f32.mxu1 %vm1716_vm1, %v1715_v3 }
 0x228   :  { %v620_v12 = vand.u32 4294901760, %v619_v11  ;;  %1626 = vmatprep.subr.mxu1 %v1715_v3 }
 0x22a   :  { %1619 = vmatmul.mubr.f32.vlgmr.msra.gmra.mxu1 %v620_v12  ;;  %v621_v14 = vsub.f32 %v619_v11, %v620_v12 }
 0x22b   :  { %1627 = vmatpush3.msra.mxu1 %v583_v58  ;;  %1628 = vmatprep.mubr.msk.f32.mxu1 %vm1716_vm1, %v1715_v3 }
 0x22c   :  { %v622_v15 = vand.u32 4294901760, %v621_v14  ;;  %1636 = vmatprep.subr.mxu1 %v1715_v3 }
 0x22e   :  { %1604 = vmatmul.mubr.f32.vlgmr.msra.gmra.mxu0 %v622_v15  ;;  %1629 = vmatmul.mubr.f32.vlgmr.msra.gmra.mxu1 %v618_v8 }
 0x22f   :  { %1612 = vmatpush3.msra.mxu0 %v660_v59  ;;  %1613 = vmatprep.mubr.msk.f32.mxu0 %vm1716_vm1, %v1715_v3 }
 0x230   :  { %1621 = vmatprep.subr.mxu0 %v1715_v3  ;;  %1637 = vmatpush3.msra.mxu1 %v1112_v16 }
 0x231   :  { %1638 = vmatprep.mubr.msk.f32.mxu1 %vm1716_vm1, %v1715_v3  ;;  %1646 = vmatprep.subr.mxu1 %v1715_v3 }
 0x232   :  { %1614 = vmatmul.mubr.f32.vlgmr.msra.gmra.mxu0 %v619_v11  ;;  %1639 = vmatmul.mubr.f32.vlgmr.msra.gmra.mxu1 %v618_v8 }
 0x233   :  { %1622 = vmatpush3.msra.mxu0 %v661_v60  ;;  %1623 = vmatprep.mubr.msk.f32.mxu0 %vm1716_vm1, %v1715_v3 }
 0x234   :  { %1631 = vmatprep.subr.mxu0 %v1715_v3  ;;  %1647 = vmatpush3.msra.mxu1 %v1032_v1 }
 0x235   :  { %1648 = vmatprep.mubr.msk.f32.mxu1 %vm1716_vm1, %v1715_v3  ;;  %1656 = vmatprep.subr.mxu1 %v1715_v3 }
 0x236   :  { %1624 = vmatmul.mubr.f32.vlgmr.msra.gmra.mxu0 %v618_v8  ;;  %1649 = vmatmul.mubr.f32.vlgmr.msra.gmra.mxu1 %v620_v12 }
 0x237   :  { %1632 = vmatpush3.msra.mxu0 %v1032_v1  ;;  %1633 = vmatprep.mubr.msk.f32.mxu0 %vm1716_vm1, %v1715_v3 }
 0x238   :  { %1641 = vmatprep.subr.mxu0 %v1715_v3  ;;  %1657 = vmatpush3.msra.mxu1 %v1032_v1 }
 0x239   :  { %1658 = vmatprep.mubr.msk.f32.mxu1 %vm1716_vm1, %v1715_v3 }
 0x23a   :  { %1634 = vmatmul.mubr.f32.vlgmr.msra.gmra.mxu0 %v622_v15  ;;  %1659 = vmatmul.mubr.f32.vlgmr.msra.gmra.mxu1 %v618_v8 }
 0x23b   :  { %1642 = vmatpush3.msra.mxu0 %v1109_v4  ;;  %1643 = vmatprep.mubr.msk.f32.mxu0 %vm1716_vm1, %v1715_v3 }
 0x23c   :  { %1651 = vmatprep.subr.mxu0 %v1715_v3 }
 0x23e   :  { %1644 = vmatmul.mubr.f32.vlgmr.msra.gmra.mxu0 %v619_v11 }
 0x23f   :  { %1652 = vmatpush3.msra.mxu0 %v1110_v9  ;;  %1653 = vmatprep.mubr.msk.f32.mxu0 %vm1716_vm1, %v1715_v3 }
 0x242   :  { %1654 = vmatmul.mubr.f32.vlgmr.msra.gmra.mxu0 %v618_v8 }
 0x2af   :  { %v543_v19 = vpop.xlane.xlu1 %542 }
 0x2b0   :  { %v544_v20 = vsub.f32 %v539_v18, %v543_v19 }
 0x2b2   :  { %546 = vst.msk [vmem:[%s1905_s7] sm:$0x3] %vm545_vm4, %v544_v20  ;;  %s1671_s7 = scalar_lea.vmem %s1455_s15, 32 }
 0x2b3   :  { %p1672_p0 = scmp.ne.s32.totalorder %s1455_s15, %s1671_s7  ;;  %p1677_p2 = scmp.lt.s32.totalorder %s1671_s7, %s1671_s7 }
 0x2b5   :  { %p1678_p3 = por %p1677_p2, %p1676_p1 }
 0x2b7   :  { %p1679_p4 = pnand %p1678_p3, %p1672_p0 }
 0x2e6   :  { %v700_v21 = vpop.f32.mrf.mxu1 }
 0x2e8   :  { %v1610_v22 = vpop.f32.mrf.mxu1 }
 0x2ea   :  { %v848_v23 = vpop.f32.mrf.mxu1 }
 0x2ec   :  { %v1620_v24 = vpop.f32.mrf.mxu1 }
 0x2ee   :  { %v624_v25 = vpop.f32.mrf.mxu0  ;;  %v994_v26 = vpop.f32.mrf.mxu1 }
 0x2ef   :  { %v701_v3 = vadd.f32 %v700_v21, %v624_v25 }
 0x2f0   :  { %v1605_v27 = vpop.f32.mrf.mxu0  ;;  %v1630_v28 = vpop.f32.mrf.mxu1 }
 0x2f2   :  { %v774_v29 = vpop.f32.mrf.mxu0  ;;  %v1149_v30 = vpop.f32.mrf.mxu1 }
 0x2f3   :  { %v775_v31 = vadd.f32 %v774_v29, %v701_v3 }
 0x2f4   :  { %v1615_v32 = vpop.f32.mrf.mxu0  ;;  %v1640_v33 = vpop.f32.mrf.mxu1 }
 0x2f5   :  { %v849_v34 = vadd.f32 %v848_v23, %v775_v31 }
 0x2f6   :  { %v922_v35 = vpop.f32.mrf.mxu0  ;;  %v1297_v36 = vpop.f32.mrf.mxu1 }
 0x2f7   :  { %v923_v37 = vadd.f32 %v922_v35, %v849_v34 }
 0x2f8   :  { %v1625_v38 = vpop.f32.mrf.mxu0  ;;  %v1650_v39 = vpop.f32.mrf.mxu1 }
 0x2f9   :  { %v995_v40 = vadd.f32 %v994_v26, %v923_v37 }
 0x2fa   :  { %v1073_v41 = vpop.f32.mrf.mxu0  ;;  %v1443_v42 = vpop.f32.mrf.mxu1 }
 0x2fb   :  { %999 = vst.msk [vmem:[#allocation2] sm:$0x3] %vm998_vm5, %v995_v40 }
 0x2fc   :  { %v1635_v43 = vpop.f32.mrf.mxu0  ;;  %v1660_v44 = vpop.f32.mrf.mxu1 }
 0x2fd   :  { %1682 = shalt.err (!%p1679_p4)
}
 0x2fe   :  { %1457 = dma.vmem_to_hbm [thread:$0]  %s1455_s15, 32, %s1903_s5, [#allocation3]   ;;  %v1150_v45 = vadd.f32 %v1149_v30, %v1073_v41  ;;  %v1223_v46 = vpop.f32.mrf.mxu0 }
 0x2ff   :  { %s1718_s18 = smov [#allocation4]  }
 0x300   :  { %v1224_v47 = vadd.f32 %v1223_v46, %v1150_v45  ;;  %v1645_v48 = vpop.f32.mrf.mxu0  ;;  %s1464_s19 = sshll.u32 %s1718_s18, 4  ;;  %s1465_s19 = int_to_ptr.vmem [resolvable:$true] %s1464_s19 }
 0x301   :  { %s1691_s20 = scalar_lea.vmem %s1465_s19, 32  ;;  %p1696_p6 = scmp.lt.s32.totalorder %s1465_s19, %s1465_s19 }
 0x302   :  { %v1298_v49 = vadd.f32 %v1297_v36, %v1224_v47  ;;  %v1371_v50 = vpop.f32.mrf.mxu0  ;;  %p1692_p5 = scmp.ne.s32.totalorder %s1465_s19, %s1691_s20  ;;  %p1697_p7 = scmp.lt.s32.totalorder %s1691_s20, %s1691_s20 }
 0x304   :  { %v1372_v51 = vadd.f32 %v1371_v50, %v1298_v49  ;;  %v1655_v52 = vpop.f32.mrf.mxu0  ;;  %p1698_p8 = por %p1697_p7, %p1696_p6 }
 0x306   :  { %v1444_v53 = vadd.f32 %v1443_v42, %v1372_v51  ;;  %p1699_p9 = pnand %p1698_p8, %p1692_p5 }
 0x308   :  { %1447 = vst.msk [vmem:[#allocation4] sm:$0x3] %vm526_vm2, %v1444_v53 }
 0x309   :  { %1702 = shalt.err (!%p1699_p9)
}
 0x30a   :  { %1467 = dma.vmem_to_hbm [thread:$0]  %s1465_s19, 32, %s1904_s6, [#allocation5]  }
 0x30b   :  { %1711 = dma.done.wait [#allocation3], 32  }
 0x30c   :  { %1712 = vsyncadd [#allocation3], 4294967264 }
 0x30d   :  { %1713 = dma.done.wait [#allocation5], 32  }
 0x30e   :  { %1714 = vsyncadd [#allocation5], 4294967264 }
 0x30f   :  { %1478 = vsyncpa [#allocation3], 1 }
 0x310   :  { %1479 = vsyncpa [#allocation5], 1 }

</bundles_post_ra>
